<compile_context>
chip_gen: v6e
topology: v6e:2x2x1
jax: 0.10.0
libtpu: 0.0.40
codegen_flags: <defaults>
</compile_context>

<pallas_src>
import functools
import math
from typing import Any, NamedTuple, Optional

import jax
import jax.numpy as jnp
from jax.experimental import pallas as pl
from jax.experimental.pallas import tpu as pltpu


# ---------------------------------------------------------------------------
# Tiling plan
# ---------------------------------------------------------------------------

def _round_up(x, m):
    return (x + m - 1) // m * m


def _cdiv(a, b):
    return (a + b - 1) // b


def _lane_align(dim):
    """Prefer 256-aligned lane tiles (full 2x256x256 MXU passes on v6e/v7x); fall back to
    128 when 256-padding would waste more than ~12.5% of the axis (v5e is fine at 128)."""
    a128 = _round_up(max(dim, 1), 128)
    a256 = _round_up(max(dim, 1), 256)
    return 256 if a256 * 8 <= a128 * 9 else 128


def _even_split(dim, align, cap):
    """Split `dim` into equal align-multiple tiles no larger than `cap`, minimizing padding.
    Returns (tile, padded_dim, num_tiles)."""
    dp = _round_up(max(dim, align), align)
    nt = _cdiv(dp, cap)
    tile = _round_up(_cdiv(dp, nt), align)
    return tile, tile * nt, nt


def _vmem_budget():
    """(working-set budget, physical VMEM capacity) for the current TPU generation."""
    try:
        cap = int(pltpu.get_tpu_info().vmem_capacity_bytes)
    except Exception:  # no TPU info available -> assume the smallest (v7x: 64 MiB / TC)
        cap = 64 << 20
    return min(int(cap * 0.55), 72 << 20), cap


def _working_set(tm, tk, tn, in_isz, out_isz, multi_k):
    """Double-buffered VMEM working set of one grid step (bytes)."""
    b = 2 * tm * tk * in_isz        # x tiles
    b += 2 * tk * tn * in_isz       # weight tiles
    b += 2 * tm * tn * out_isz      # output tiles
    b += 2 * tn * 4                 # f32 bias tile
    if multi_k:
        b += tm * tn * 4            # f32 accumulator scratch
    return b


class _Plan(NamedTuple):
    tm: int
    tn: int
    tk: int
    bp: int
    fp: int
    np_: int
    multi_k: bool


@functools.lru_cache(maxsize=None)
def _plan(B, F, N, in_isz, out_isz, budget_override=None):
    narrow = in_isz < 4
    budget, _ = _vmem_budget()
    if budget_override is not None:
        budget = int(budget_override)

    # bf16 packs (16, 128) per vreg: keep M tiles 16-aligned unless B itself is tiny.
    m_align = 16 if (narrow and B > 8) else 8
    tm, bp, _ = _even_split(B, m_align, 512)

    k_align = _lane_align(F)
    n_align = _lane_align(N)
    fp_min = _round_up(max(F, k_align), k_align)
    np_min = _round_up(max(N, n_align), n_align)

    if _working_set(tm, fp_min, n_align, in_isz, out_isz, False) <= budget:
        # Single K step: whole (padded) reduction axis resident, no accumulator scratch,
        # no k==0 / k==last predication, one unmasked epilogue store per (i, j).
        tk = fp = fp_min
        tn_cap = n_align
        while tn_cap < min(np_min, 2048):
            nxt = tn_cap + n_align
            if _working_set(tm, tk, nxt, in_isz, out_isz, False) > budget:
                break
            tn_cap = nxt
        tn, np_, gn = _even_split(N, n_align, tn_cap)
        # v7x megacore: keep a parallel axis with >= 2 blocks when N is big enough.
        if bp == tm and gn == 1 and np_ >= 1024:
            tn, np_, gn = _even_split(N, n_align, _round_up(_cdiv(np_, 2), n_align))
        return _Plan(tm, tn, tk, bp, fp, np_, False)

    # Fallback for large F: tile the reduction axis with an f32 VMEM accumulator.
    tn, np_, _ = _even_split(N, n_align, 512)
    tk_cap = k_align
    while tk_cap < 4096:
        nxt = tk_cap + k_align
        if _working_set(tm, nxt, tn, in_isz, out_isz, True) > budget:
            break
        tk_cap = nxt
    tk, fp, _ = _even_split(F, k_align, tk_cap)
    return _Plan(tm, tn, tk, bp, fp, np_, True)


# ---------------------------------------------------------------------------
# Kernels
# ---------------------------------------------------------------------------

def _mm_kernel(x_ref, w_ref, o_ref):
    o_ref[...] = jnp.dot(x_ref[...], w_ref[...],
                         preferred_element_type=jnp.float32).astype(o_ref.dtype)


def _mm_bias_kernel(x_ref, w_ref, b_ref, o_ref):
    acc = jnp.dot(x_ref[...], w_ref[...], preferred_element_type=jnp.float32)
    o_ref[...] = (acc + b_ref[...]).astype(o_ref.dtype)


def _mm_acc_kernel(x_ref, w_ref, o_ref, acc_ref):
    k = pl.program_id(2)

    @pl.when(k == 0)
    def _init():
        acc_ref[...] = jnp.zeros_like(acc_ref)

    acc_ref[...] += jnp.dot(x_ref[...], w_ref[...],
                            preferred_element_type=jnp.float32)

    @pl.when(k == pl.num_programs(2) - 1)
    def _finalize():
        o_ref[...] = acc_ref[...].astype(o_ref.dtype)


def _mm_bias_acc_kernel(x_ref, w_ref, b_ref, o_ref, acc_ref):
    k = pl.program_id(2)

    @pl.when(k == 0)
    def _init():
        acc_ref[...] = jnp.zeros_like(acc_ref)

    acc_ref[...] += jnp.dot(x_ref[...], w_ref[...],
                            preferred_element_type=jnp.float32)

    @pl.when(k == pl.num_programs(2) - 1)
    def _finalize():
        # Bias added exactly once, in f32, in the epilogue.
        o_ref[...] = (acc_ref[...] + b_ref[...]).astype(o_ref.dtype)


# ---------------------------------------------------------------------------
# pallas_call wrapper
# ---------------------------------------------------------------------------

def _linear_call(x_c, w_t, b2d, out_dtype, plan: _Plan):
    tm, tn, tk, bp, fp, np_, multi_k = plan
    B, F = x_c.shape
    assert w_t.shape == (fp, np_), (w_t.shape, fp, np_)
    if (B, F) != (bp, fp):
        x_c = jnp.pad(x_c, ((0, bp - B), (0, fp - F)))

    in_isz = jnp.dtype(x_c.dtype).itemsize
    out_isz = jnp.dtype(out_dtype).itemsize
    _, vmem_cap = _vmem_budget()
    ws = _working_set(tm, tk, tn, in_isz, out_isz, multi_k)
    vmem_limit = min(int(vmem_cap * 0.9), max(2 * ws, 32 << 20))

    gm, gn, gk = bp // tm, np_ // tn, fp // tk
    cost = pl.CostEstimate(
        flops=2 * bp * np_ * fp,
        transcendentals=0,
        bytes_accessed=(bp * fp * in_isz) * gn       # x streamed once per N tile
                       + (fp * np_ * in_isz) * gm    # w streamed once per M tile
                       + (0 if b2d is None else np_ * 4 * gm)
                       + bp * np_ * out_isz,         # output written once
    )
    out_shape = jax.ShapeDtypeStruct((bp, np_), out_dtype)

    if multi_k:
        grid = (gm, gn, gk)
        x_spec = pl.BlockSpec((tm, tk), lambda i, j, k: (i, k))
        # NOTE: if profiling ever shows exposed K-stream DMA, add
        #   pipeline_mode=pl.Buffered(3)
        # to w_spec (cheap VMEM cost at these tile sizes).
        w_spec = pl.BlockSpec((tk, tn), lambda i, j, k: (k, j))
        o_spec = pl.BlockSpec((tm, tn), lambda i, j, k: (i, j))
        b_spec = pl.BlockSpec((1, tn), lambda i, j, k: (0, j))
        cparams = pltpu.CompilerParams(
            dimension_semantics=("parallel", "parallel", "arbitrary"),
            vmem_limit_bytes=vmem_limit)
        scratch = [pltpu.VMEM((tm, tn), jnp.float32)]
        if b2d is not None:
            return pl.pallas_call(
                _mm_bias_acc_kernel, out_shape=out_shape, grid=grid,
                in_specs=[x_spec, w_spec, b_spec], out_specs=o_spec,
                scratch_shapes=scratch, compiler_params=cparams,
                cost_estimate=cost)(x_c, w_t, b2d)
        return pl.pallas_call(
            _mm_acc_kernel, out_shape=out_shape, grid=grid,
            in_specs=[x_spec, w_spec], out_specs=o_spec,
            scratch_shapes=scratch, compiler_params=cparams,
            cost_estimate=cost)(x_c, w_t)

    # Single K step: the (tm, fp) x panel stays resident across the inner N axis while the
    # weight panel streams; one unmasked lane-dense store per (i, j).
    grid = (gm, gn)
    x_spec = pl.BlockSpec((tm, fp), lambda i, j: (i, 0))
    w_spec = pl.BlockSpec((fp, tn), lambda i, j: (0, j))
    o_spec = pl.BlockSpec((tm, tn), lambda i, j: (i, j))
    b_spec = pl.BlockSpec((1, tn), lambda i, j: (0, j))
    cparams = pltpu.CompilerParams(
        dimension_semantics=("parallel", "parallel"),
        vmem_limit_bytes=vmem_limit)
    if b2d is not None:
        return pl.pallas_call(
            _mm_bias_kernel, out_shape=out_shape, grid=grid,
            in_specs=[x_spec, w_spec, b_spec], out_specs=o_spec,
            compiler_params=cparams, cost_estimate=cost)(x_c, w_t, b2d)
    return pl.pallas_call(
        _mm_kernel, out_shape=out_shape, grid=grid,
        in_specs=[x_spec, w_spec], out_specs=o_spec,
        compiler_params=cparams, cost_estimate=cost)(x_c, w_t)


# ---------------------------------------------------------------------------
# Public API
# ---------------------------------------------------------------------------

@functools.partial(jax.jit, static_argnames=("compute_dtype", "vmem_budget_bytes"))
def meta_linear_forward(x, weights, bias=None, *, compute_dtype=jnp.bfloat16,
                        vmem_budget_bytes=None):
    """Pallas equivalent of MetaLinearLayer.forward / F.linear.

    x:       (B, F)
    weights: (N, F)   (PyTorch nn.Linear / F.linear convention)
    bias:    (N,) or None
    compute_dtype: MXU operand dtype (default bf16; accumulation is always f32; pass
                   None to keep x.dtype operands).
    returns: (B, N) in x.dtype
    """
    B, F = x.shape
    N, F2 = weights.shape
    assert F == F2, "input feature dim must match weight's second dim"

    out_dtype = x.dtype
    cdt = jnp.dtype(compute_dtype if compute_dtype is not None else x.dtype)
    plan = _plan(B, F, N, cdt.itemsize, jnp.dtype(out_dtype).itemsize, vmem_budget_bytes)

    # Weight panel: transpose once to (F, N), cast to MXU dtype, zero-pad to the plan.
    # (The whole wrapper is jitted, so this fuses with the producer; use prepack_params()
    #  to do it exactly once across repeated forward calls.)
    w_t = weights.astype(cdt).T
    if w_t.shape != (plan.fp, plan.np_):
        w_t = jnp.pad(w_t, ((0, plan.fp - F), (0, plan.np_ - N)))

    b2d = None
    if bias is not None:
        b2d = bias.reshape(1, N).astype(jnp.float32)
        if plan.np_ != N:
            b2d = jnp.pad(b2d, ((0, 0), (0, plan.np_ - N)))

    out = _linear_call(x.astype(cdt), w_t, b2d, out_dtype, plan)
    if (plan.bp, plan.np_) != (B, N):
        out = out[:B, :N]
    return out


class PackedParams(NamedTuple):
    w_t: Any                 # (fp, np_) compute-dtype weight panel, transposed + padded
    b2d: Optional[Any]       # (1, np_) f32 bias, padded (or None)
    f: int
    n: int
    plan: _Plan


def prepack_params(weights, bias=None, *, batch_hint=128, compute_dtype=jnp.bfloat16):
    """Pre-transpose / pad / cast the weight panel ONCE so repeated forward calls (e.g.
    meta-learning inner loops) skip the per-call HBM transpose round-trip."""
    N, F = weights.shape
    cdt = jnp.dtype(compute_dtype if compute_dtype is not None else weights.dtype)
    plan = _plan(int(batch_hint), F, N, cdt.itemsize, 4, None)
    w_t = weights.astype(cdt).T
    if w_t.shape != (plan.fp, plan.np_):
        w_t = jnp.pad(w_t, ((0, plan.fp - F), (0, plan.np_ - N)))
    b2d = None
    if bias is not None:
        b2d = bias.reshape(1, N).astype(jnp.float32)
        if plan.np_ != N:
            b2d = jnp.pad(b2d, ((0, 0), (0, plan.np_ - N)))
    return PackedParams(w_t=w_t, b2d=b2d, f=F, n=N, plan=plan)


def meta_linear_forward_packed(x, packed: PackedParams):
    """Forward pass reusing a prepacked weight panel; only the M tile is re-derived from
    the actual batch (K/N tiling comes from the pack)."""
    B, F = x.shape
    assert F == packed.f, "input feature dim must match the packed weight"
    cdt = packed.w_t.dtype
    m_align = 16 if (jnp.dtype(cdt).itemsize < 4 and B > 8) else 8
    tm, bp, _ = _even_split(B, m_align, 512)
    plan = packed.plan._replace(tm=tm, bp=bp)
    out = _linear_call(x.astype(cdt), packed.w_t, packed.b2d, x.dtype, plan)
    return out[:B, :packed.n]


def init_meta_linear_params(key, input_size, num_filters, use_bias=True):
    """Matches MetaLinearLayer.__init__: weights (num_filters, input_size) Xavier-uniform,
    bias zeros."""
    fan_in, fan_out = input_size, num_filters
    bound = math.sqrt(6.0 / (fan_in + fan_out))  # xavier_uniform_, gain=1
    weights = jax.random.uniform(
        key, (num_filters, input_size), dtype=jnp.float32, minval=-bound, maxval=bound)
    bias = jnp.zeros((num_filters,), dtype=jnp.float32) if use_bias else None
    return weights, bias


# TODO(synk): for meta-learning inner loops over many tasks/layers with tiny (B, F, N),
# stack the per-task weights and add a leading grid axis in one pallas_call instead of one
# call per linear (amortizes the fixed launch cost); out of scope for this single layer.


if __name__ == "__main__":
    key = jax.random.PRNGKey(0)
    k_x, k_w, k_x2, k_w2, k_x3, k_w3 = jax.random.split(key, 6)

    # MetaLinearLayer interface is (b, f) -> (b, num_filters).
    batch, input_size, num_filters = 8, 32, 16
    x = jax.random.normal(k_x, (batch, input_size), dtype=jnp.float32)
    weights, bias = init_meta_linear_params(k_w, input_size, num_filters, use_bias=True)
    ref = x @ weights.T + bias

    # 1) default bf16-operand / f32-accumulate path, with bias.
    out = jax.block_until_ready(meta_linear_forward(x, weights, bias))
    assert out.shape == (batch, num_filters) and out.dtype == x.dtype
    assert jnp.allclose(out, ref, atol=5e-2, rtol=5e-2)

    # 2) exact f32 operand path.
    out_f32 = jax.block_until_ready(
        meta_linear_forward(x, weights, bias, compute_dtype=None))
    assert jnp.allclose(out_f32, ref, atol=1e-5, rtol=1e-5)

    # 3) larger multi-tile shape, no bias, prepacked (transpose-once) weight panel.
    B2, Fin2, N2 = 16, 256, 384
    x2 = jax.random.normal(k_x2, (B2, Fin2), dtype=jnp.float32)
    w2, _ = init_meta_linear_params(k_w2, Fin2, N2, use_bias=False)
    packed = prepack_params(w2, None, batch_hint=B2)
    out2 = jax.block_until_ready(meta_linear_forward_packed(x2, packed))
    ref2 = x2 @ w2.T
    assert out2.shape == (B2, N2)
    assert jnp.allclose(out2, ref2, atol=5e-2, rtol=5e-2)

    # 4) force the tiled-K accumulator fallback via a tiny VMEM budget override.
    B3, Fin3, N3 = 16, 512, 256
    x3 = jax.random.normal(k_x3, (B3, Fin3), dtype=jnp.float32)
    w3, b3 = init_meta_linear_params(k_w3, Fin3, N3, use_bias=True)
    out3 = jax.block_until_ready(
        meta_linear_forward(x3, w3, b3, vmem_budget_bytes=256 * 1024))
    ref3 = x3 @ w3.T + b3
    assert out3.shape == (B3, N3)
    assert jnp.allclose(out3, ref3, atol=5e-2, rtol=5e-2)

    print("KERNEL_OK")
</pallas_src>

<mosaic_0001>
module attributes {stable_mosaic.version = 11 : i64} {
  func.func @_mm_bias_kernel(%arg0: i32, %arg1: i32, %arg2: memref<8x128xbf16, #tpu.memory_space<vmem>>, %arg3: memref<128x128xbf16, #tpu.memory_space<vmem>>, %arg4: memref<1x128xf32, #tpu.memory_space<vmem>>, %arg5: memref<8x128xf32, #tpu.memory_space<vmem>>) attributes {dimension_semantics = [#tpu.dimension_semantics<parallel>, #tpu.dimension_semantics<parallel>], iteration_bounds = array<i64: 1, 1>, scalar_prefetch = 0 : i64, scratch_operands = 0 : i64, tpu.core_type = #tpu.core_type<tc>, window_params = [{transform_indices = @transform_0, window_bounds = array<i64: 8, 128>}, {transform_indices = @transform_1, window_bounds = array<i64: 128, 128>}, {transform_indices = @transform_2, window_bounds = array<i64: 1, 128>}, {transform_indices = @transform_3, window_bounds = array<i64: 8, 128>}]} {
    %c0 = arith.constant 0 : index
    %c0_0 = arith.constant 0 : index
    %0 = vector.load %arg2[%c0, %c0_0] : memref<8x128xbf16, #tpu.memory_space<vmem>>, vector<8x128xbf16>
    %c0_1 = arith.constant 0 : index
    %c0_2 = arith.constant 0 : index
    %1 = vector.load %arg3[%c0_1, %c0_2] : memref<128x128xbf16, #tpu.memory_space<vmem>>, vector<128x128xbf16>
    %cst = arith.constant dense<0.000000e+00> : vector<8x128xf32>
    %2 = tpu.matmul %0, %1, %cst {dimension_numbers = #tpu.dot_dimension_numbers<[1], [0], [0], [1], [0, 0, 1, 1], [], []>} : vector<8x128xbf16>, vector<128x128xbf16>, vector<8x128xf32> -> vector<8x128xf32>
    %c0_3 = arith.constant 0 : index
    %c0_4 = arith.constant 0 : index
    %3 = vector.load %arg4[%c0_3, %c0_4] : memref<1x128xf32, #tpu.memory_space<vmem>>, vector<1x128xf32>
    %4 = vector.broadcast %3 : vector<1x128xf32> to vector<8x128xf32>
    %5 = arith.addf %2, %4 : vector<8x128xf32>
    %c0_5 = arith.constant 0 : index
    %c0_6 = arith.constant 0 : index
    %6 = vector.load %arg5[%c0_5, %c0_6] : memref<8x128xf32, #tpu.memory_space<vmem>>, vector<8x128xf32>
    tpu.vector_store %arg5[%c0_5, %c0_6], %5 {strides = array<i32>} : memref<8x128xf32, #tpu.memory_space<vmem>>, vector<8x128xf32>,
    return
  }
  func.func @transform_0(%arg0: i32, %arg1: i32) -> (i32, i32) {
    %c0_i32 = arith.constant 0 : i32
    %c0_i32_0 = arith.constant 0 : i32
    return %arg0, %c0_i32 : i32, i32
  }
  func.func @transform_1(%arg0: i32, %arg1: i32) -> (i32, i32) {
    %c0_i32 = arith.constant 0 : i32
    %c0_i32_0 = arith.constant 0 : i32
    return %c0_i32, %arg1 : i32, i32
  }
  func.func @transform_2(%arg0: i32, %arg1: i32) -> (i32, i32) {
    %c0_i32 = arith.constant 0 : i32
    %c0_i32_0 = arith.constant 0 : i32
    return %c0_i32, %arg1 : i32, i32
  }
  func.func @transform_3(%arg0: i32, %arg1: i32) -> (i32, i32) {
    %c0_i32 = arith.constant 0 : i32
    return %arg0, %arg1 : i32, i32
  }
}

</mosaic_0001>

<bundles_post_ra>
// kernel: meta_linear_forward.1
= control target key start
LH: loop header
LB: loop body
LE: loop exit
PB: predicated region body
PF: predicated region fallthrough
CT: control target
= control target key end

     0   :  { %v214_v1 = vmov 0.0   ;;  %vm215_vm0 = vmmov 0   ;;  %s270_s0 = inlined_call_operand.vmem [shape: bf16[8,128], index: 0, kind: input, shape index: {}]   ;;  %s271_s1 = inlined_call_operand.vmem [shape: bf16[128,128], index: 1, kind: input, shape index: {}]   ;;  %s272_s2 = inlined_call_operand.vmem [shape: f32[1,128], index: 2, kind: input, shape index: {}]   ;;  %s273_s3 = inlined_call_operand.hbm [shape: f32[8,128], index: 3, kind: output, shape index: {}]  }
   0x1   :  { %v184_v0 = vld [vmem:[%s271_s1 + $0x38] sm:$0xff]   ;;  %161 = vmatprep.subr.bf16.mxu0 %v214_v1  ;;  %v185_v2 = vld [vmem:[%s271_s1 + $0x30] sm:$0xff]   ;;  %177 = vmatprep.mubr.msk.bf16.mxu0 %vm215_vm0, %v214_v1  ;;  %v186_v3 = vld [vmem:[%s271_s1 + $0x28] sm:$0xff]  }
   0x2   :  { %162 = vmatpush3.bf16.msra.mxu0 %v184_v0 }
   0x3   :  { %163 = vmatprep.subr.bf16.mxu0 %v214_v1 }
   0x6   :  { %164 = vmatpush3.bf16.msra.mxu0 %v185_v2 }
   0x7   :  { %165 = vmatprep.subr.bf16.mxu0 %v214_v1 }
   0x8   :  { %8 = vsyncpa [#allocation3], 0  ;;  %v187_v4 = vld [vmem:[%s271_s1 + $0x20] sm:$0xff]   ;;  %v188_v5 = vld [vmem:[%s271_s1 + $0x18] sm:$0xff]   ;;  %s216_s5 = smov [#allocation2]  }
   0x9   :  { %v189_v6 = vld [vmem:[%s271_s1 + $0x10] sm:$0xff]   ;;  %v190_v7 = vld [vmem:[%s271_s1 + $0x8] sm:$0xff]   ;;  %v191_v8 = vld [vmem:[%s271_s1] sm:$0xff]   ;;  %s135_s6 = sshll.u32 %s216_s5, 4  ;;  %s136_s6 = int_to_ptr.vmem [resolvable:$true] %s135_s6 }
   0xa   :  { %166 = vmatpush3.bf16.msra.mxu0 %v186_v3  ;;  %v16_v9 = vld [vmem:[%s270_s0] sm:$0xf]  ;;  %s192_s1 = scalar_lea.vmem %s136_s6, 128  ;;  %p197_p1 = scmp.lt.s32.totalorder %s136_s6, %s136_s6 }
   0xb   :  { %167 = vmatprep.subr.bf16.mxu0 %v214_v1  ;;  %v143_v10 = vld [vmem:[%s272_s2] ss:$0 sm:$0xff]  ;;  %p193_p0 = scmp.ne.s32.totalorder %s136_s6, %s192_s1  ;;  %p198_p2 = scmp.lt.s32.totalorder %s192_s1, %s192_s1 }
   0xd   :  { %p199_p3 = por %p198_p2, %p197_p1 }
   0xe   :  { %168 = vmatpush3.bf16.msra.mxu0 %v187_v4 }
   0xf   :  { %169 = vmatprep.subr.bf16.mxu0 %v214_v1  ;;  %p200_p4 = pnand %p199_p3, %p193_p0 }
  0x12   :  { %170 = vmatpush3.bf16.msra.mxu0 %v188_v5 }
  0x13   :  { %171 = vmatprep.subr.bf16.mxu0 %v214_v1 }
  0x16   :  { %172 = vmatpush3.bf16.msra.mxu0 %v189_v6 }
  0x17   :  { %173 = vmatprep.subr.bf16.mxu0 %v214_v1 }
  0x1a   :  { %174 = vmatpush3.bf16.msra.mxu0 %v190_v7 }
  0x1b   :  { %175 = vmatprep.subr.bf16.mxu0 %v214_v1 }
  0x1e   :  { %176 = vmatpush3.bf16.msra.mxu0 %v191_v8 }
  0x21   :  { %178 = vmatmul.mubr.bf16.vlgmr.msra.gmra.mxu0 %v16_v9 }
  0xe1   :  { %v122_v11 = vpop.f32.mrf.mxu0 }
  0xe2   :  { %v123_v12 = vadd.f32 %v143_v10, %v122_v11 }
  0xe3   :  { %v179_v13 = vpop.f32.mrf.mxu0 }
  0xe4   :  { %128 = vst [vmem:[#allocation2] sm:$0xff] %v123_v12 }
  0xe5   :  { %v125_v14 = vpop.f32.mrf.mxu0 }
  0xe6   :  { %203 = shalt.err (!%p200_p4)
}
  0xe7   :  { %138 = dma.vmem_to_hbm [thread:$0]  %s136_s6, 128, %s273_s3, [#allocation3]   ;;  %v180_v15 = vpop.f32.mrf.mxu0 }
  0xe8   :  { %212 = dma.done.wait [#allocation3], 128  }
  0xe9   :  { %213 = vsyncadd [#allocation3], 4294967168 }
  0xea   :  { %142 = vsyncpa [#allocation3], 1 }

</bundles_post_ra>
